<compile_context>
chip_gen: v5e
topology: v5e:2x2
jax: 0.10.0
libtpu: 0.0.40
codegen_flags: <defaults>
</compile_context>

<pallas_src>
import jax
import jax.numpy as jnp
from jax.experimental import pallas as pl
from jax.experimental.pallas import tpu as pltpu


def _softshrink_kernel(x_ref, o_ref, *, lambd):
    x = x_ref[...]
    zero = jnp.zeros_like(x)
    o_ref[...] = jnp.where(
        x > lambd,
        x - lambd,
        jnp.where(x < -lambd, x + lambd, zero),
    )


def _jnp_softshrink(x, lambd):
    return jnp.where(
        x > lambd,
        x - lambd,
        jnp.where(x < -lambd, x + lambd, jnp.zeros_like(x)),
    )


def softshrink(x, lambd=0.5, *, target_block_bytes=4 << 20):
    """Elementwise SoftShrink. Accepts any shape / float dtype."""
    orig_shape = x.shape
    dtype = x.dtype
    total = x.size
    if total == 0:
        return x
    itemsize = jnp.dtype(dtype).itemsize

    # Tail that is not a multiple of 128 lanes is handled outside the kernel
    # (tiny fused jnp op) instead of padding + re-slicing the whole array.
    main = (total // 128) * 128
    tail = total - main
    if main == 0:
        # < 128 elements: single fused XLA elementwise op is already optimal.
        return _jnp_softshrink(x, lambd)

    x_flat = jnp.ravel(x)  # free bitcast for contiguous input

    # Widest lane width that divides the aligned prefix (prefer lane-dense).
    lanes = 128
    for w in (1024, 512, 256):
        if main % w == 0:
            lanes = w
            break

    x_main = x_flat if tail == 0 else x_flat[:main]
    n_rows = main // lanes
    x2d = x_main.reshape(n_rows, lanes)

    bytes_per_row = lanes * itemsize
    # Native sublane packing: 8 rows (f32), 16 (bf16/f16), 32 (int8/fp8).
    sub = max(8, 32 // itemsize)

    vmem_limit = 32 << 20
    # Double-buffered in + out => 4x block resident; leave headroom for
    # compiler internal scratch (important on v7x, where 32 MiB is the
    # scoped default of its 64 MiB physical VMEM).
    max_block_bytes = min(target_block_bytes, (vmem_limit - (8 << 20)) // 4)
    block_rows = max(1, max_block_bytes // bytes_per_row)

    if n_rows >= 2 * sub:
        # Keep at least 2 grid steps so both v7x TensorCores stream blocks.
        cap = (n_rows // 2 // sub) * sub
        block_rows = min(block_rows, cap)
        block_rows = max(sub, (block_rows // sub) * sub)
    else:
        block_rows = n_rows  # small input: single full-extent block

    grid = (pl.cdiv(n_rows, block_rows),)  # ragged last row-block is masked

    cost = pl.CostEstimate(
        flops=6 * main,
        transcendentals=0,
        bytes_accessed=2 * main * itemsize,
    )

    out2d = pl.pallas_call(
        lambda x_ref, o_ref: _softshrink_kernel(x_ref, o_ref, lambd=lambd),
        out_shape=jax.ShapeDtypeStruct((n_rows, lanes), dtype),
        grid_spec=pltpu.PrefetchScalarGridSpec(
            num_scalar_prefetch=0,
            grid=grid,
            in_specs=[pl.BlockSpec((block_rows, lanes), lambda i: (i, 0))],
            out_specs=pl.BlockSpec((block_rows, lanes), lambda i: (i, 0)),
        ),
        compiler_params=pltpu.CompilerParams(
            dimension_semantics=("parallel",),
            vmem_limit_bytes=vmem_limit,
        ),
        cost_estimate=cost,
    )(x2d)

    out_main = out2d.reshape(-1)
    if tail == 0:
        return out_main.reshape(orig_shape)
    out_tail = _jnp_softshrink(x_flat[main:], lambd)
    return jnp.concatenate([out_main, out_tail]).reshape(orig_shape)


class CustomSoftShrink:
    """Mirror of the PyTorch module's forward pass."""

    def __init__(self, lambd=0.5):
        self.lambd = lambd

    def __call__(self, x):
        return softshrink(x, self.lambd)


if __name__ == "__main__":
    key = jax.random.PRNGKey(0)
    module = CustomSoftShrink(lambd=0.5)

    # Primary case (matches the PyTorch module's typical 4-D input).
    x = jax.random.normal(key, (2, 4, 16, 16), dtype=jnp.float32)
    out = module(x)
    jax.block_until_ready(out)
    assert out.shape == x.shape and out.dtype == x.dtype
    assert jnp.allclose(out, _jnp_softshrink(x, 0.5), atol=1e-6, rtol=1e-6)

    # Multi-block grid path (>= 2 grid steps).
    x_big = jax.random.normal(jax.random.PRNGKey(1), (64, 256), dtype=jnp.float32)
    out_big = softshrink(x_big, 0.5)
    jax.block_until_ready(out_big)
    assert jnp.allclose(out_big, _jnp_softshrink(x_big, 0.5), atol=1e-6, rtol=1e-6)

    # Size not a multiple of 128: kernel on the prefix + tiny jnp tail.
    x_rag = jax.random.normal(jax.random.PRNGKey(2), (9, 130), dtype=jnp.float32)
    out_rag = softshrink(x_rag, 0.5)
    jax.block_until_ready(out_rag)
    assert jnp.allclose(out_rag, _jnp_softshrink(x_rag, 0.5), atol=1e-6, rtol=1e-6)

    # Tiny (< 128 elements) fallback path.
    x_tiny = jax.random.normal(jax.random.PRNGKey(3), (3, 5, 7), dtype=jnp.float32)
    out_tiny = softshrink(x_tiny, 0.5)
    jax.block_until_ready(out_tiny)
    assert jnp.allclose(out_tiny, _jnp_softshrink(x_tiny, 0.5), atol=1e-6, rtol=1e-6)

    # bf16 exercises the dtype-aware (16-row) sublane rounding.
    x_bf = jax.random.normal(jax.random.PRNGKey(4), (64, 512), dtype=jnp.bfloat16)
    out_bf = softshrink(x_bf, 0.5)
    jax.block_until_ready(out_bf)
    assert out_bf.dtype == jnp.bfloat16
    assert jnp.allclose(out_bf.astype(jnp.float32),
                        _jnp_softshrink(x_bf, 0.5).astype(jnp.float32),
                        atol=1e-2, rtol=1e-2)

    print("KERNEL_OK")
</pallas_src>

<mosaic_0001>
module attributes {stable_mosaic.version = 11 : i64} {
  func.func @_lambda_(%arg0: i32, %arg1: memref<2x1024xf32, #tpu.memory_space<vmem>>, %arg2: memref<2x1024xf32, #tpu.memory_space<vmem>>) attributes {dimension_semantics = [#tpu.dimension_semantics<parallel>], iteration_bounds = array<i64: 1>, scalar_prefetch = 0 : i64, scratch_operands = 0 : i64, tpu.core_type = #tpu.core_type<tc>, window_params = [{transform_indices = @transform_0, window_bounds = array<i64: 2, 1024>}, {transform_indices = @transform_1, window_bounds = array<i64: 2, 1024>}]} {
    %c0 = arith.constant 0 : index
    %c0_0 = arith.constant 0 : index
    %0 = vector.load %arg1[%c0, %c0_0] : memref<2x1024xf32, #tpu.memory_space<vmem>>, vector<2x1024xf32>
    %cst = arith.constant 0.000000e+00 : f32
    %1 = vector.broadcast %cst : f32 to vector<2x1024xf32>
    %cst_1 = arith.constant 5.000000e-01 : f32
    %2 = vector.broadcast %cst_1 : f32 to vector<2x1024xf32>
    %3 = arith.cmpf ogt, %0, %2 : vector<2x1024xf32>
    %cst_2 = arith.constant 5.000000e-01 : f32
    %4 = vector.broadcast %cst_2 : f32 to vector<2x1024xf32>
    %5 = arith.subf %0, %4 : vector<2x1024xf32>
    %cst_3 = arith.constant -5.000000e-01 : f32
    %6 = vector.broadcast %cst_3 : f32 to vector<2x1024xf32>
    %7 = arith.cmpf olt, %0, %6 : vector<2x1024xf32>
    %cst_4 = arith.constant 5.000000e-01 : f32
    %8 = vector.broadcast %cst_4 : f32 to vector<2x1024xf32>
    %9 = arith.addf %0, %8 : vector<2x1024xf32>
    %10 = arith.select %7, %9, %1 : vector<2x1024xi1>, vector<2x1024xf32>
    %11 = arith.select %3, %5, %10 : vector<2x1024xi1>, vector<2x1024xf32>
    %c0_5 = arith.constant 0 : index
    %c0_6 = arith.constant 0 : index
    %12 = vector.load %arg2[%c0_5, %c0_6] : memref<2x1024xf32, #tpu.memory_space<vmem>>, vector<2x1024xf32>
    tpu.vector_store %arg2[%c0_5, %c0_6], %11 {strides = array<i32>} : memref<2x1024xf32, #tpu.memory_space<vmem>>, vector<2x1024xf32>,
    return
  }
  func.func @transform_0(%arg0: i32) -> (i32, i32) {
    %c0_i32 = arith.constant 0 : i32
    %c0_i32_0 = arith.constant 0 : i32
    return %arg0, %c0_i32 : i32, i32
  }
  func.func @transform_1(%arg0: i32) -> (i32, i32) {
    %c0_i32 = arith.constant 0 : i32
    %c0_i32_0 = arith.constant 0 : i32
    return %arg0, %c0_i32 : i32, i32
  }
}

</mosaic_0001>

<bundles_post_ra>
// kernel: tpu_custom_call.1
= control target key start
LH: loop header
LB: loop body
LE: loop exit
PB: predicated region body
PF: predicated region fallthrough
CT: control target
= control target key end

     0   :  { %6 = vsyncpa [#allocation3], 0  ;;  %s130_s0 = inlined_call_operand.hbm [shape: f32[2,1024], index: 0, kind: input, shape index: {}]   ;;  %s131_s1 = inlined_call_operand.hbm [shape: f32[2,1024], index: 1, kind: output, shape index: {}]  }
   0x1   :  { %7 = vsyncpa [#allocation4], 0  ;;  %s13_s8 = sshll.u32 %s130_s0, 4  ;;  %s112_s9 = smov [#allocation2]   ;;  %s14_s8 = int_to_ptr.hbm [resolvable:$true] %s13_s8 }
   0x2   :  { %s15_s10 = sshll.u32 %s112_s9, 4  ;;  %s16_s10 = int_to_ptr.vmem [resolvable:$true] %s15_s10 }
   0x3   :  { %18 = dma.hbm_to_vmem [thread:$0]  %s14_s8, 256, %s16_s10, [#allocation3]  }
   0x4   :  { %108 = dma.done.wait [#allocation3], 256  }
   0x5   :  { %109 = vsyncadd [#allocation3], 4294967040  ;;  %v23_v0 = vld [vmem:[#allocation2] sm:$0xff]  ;;  %v24_v1 = vld [vmem:[#allocation2 + $0x8] sm:$0xff]  ;;  %s113_s11 = smov [#allocation5]   ;;  %s46_s15 = sshll.u32 %s131_s1, 4  ;;  %s47_s15 = int_to_ptr.hbm [resolvable:$true] %s46_s15 }
   0x6   :  { %vm25_vm0 = vcmp.gt.f32.partialorder %v23_v0, 0.5  ;;  %v56_v2 = vadd.f32 -0.5, %v23_v0  ;;  %vm29_vm1 = vcmp.lt.f32.partialorder %v23_v0, -0.5  ;;  %v31_v3 = vadd.f32 0.5, %v23_v0  ;;  %s44_s12 = sshll.u32 %s113_s11, 4  ;;  %s45_s12 = int_to_ptr.vmem [resolvable:$true] %s44_s12 }
   0x7   :  { %vm26_vm2 = vcmp.gt.f32.partialorder %v24_v1, 0.5  ;;  %v57_v4 = vadd.f32 -0.5, %v24_v1  ;;  %vm30_vm3 = vcmp.lt.f32.partialorder %v24_v1, -0.5  ;;  %v32_v5 = vadd.f32 0.5, %v24_v1 }
   0x8   :  { %v33_v6 = vsel %vm29_vm1, %v31_v3, 0.0 }
   0x9   :  { %v35_v7 = vsel %vm25_vm0, %v56_v2, %v33_v6  ;;  %v34_v8 = vsel %vm30_vm3, %v32_v5, 0.0 }
   0xa   :  { %37 = vst [vmem:[#allocation5] sm:$0xff] %v35_v7  ;;  %v36_v9 = vsel %vm26_vm2, %v57_v4, %v34_v8 }
   0xb   :  { %38 = vst [vmem:[#allocation5 + $0x8] sm:$0xff] %v36_v9 }
   0xc   :  { %49 = dma.vmem_to_hbm [thread:$0]  %s45_s12, 256, %s47_s15, [#allocation4]  }
   0xd   :  { %110 = dma.done.wait [#allocation4], 256  }
   0xe   :  { %111 = vsyncadd [#allocation4], 4294967040 }
   0xf   :  { %54 = vsyncpa [#allocation3], 1 }
  0x10   :  { %55 = vsyncpa [#allocation4], 1 }

</bundles_post_ra>
